<compile_context>
chip_gen: v7x
topology: tpu7x:2x2x1
jax: 0.10.0
libtpu: 0.0.40
codegen_flags: <defaults>
</compile_context>

<pallas_src>
import jax
import jax.numpy as jnp
from jax.experimental import pallas as pl
from jax.experimental.pallas import tpu as pltpu

_LANE = 128
_ROW_ALIGN = 16           # bf16-friendly sublane multiple for the batch axis
_MIN_SPLIT_ROWS = 256     # only split into >=2 tiles past this many rows
_VMEM_CAP = 48 << 20      # v7x-safe scoped-VMEM budget (64 MiB physical per TC)


def _policy_mlp_kernel(x_ref, w1_ref, b1_ref, w2_ref, b2_ref, w3_ref, b3_ref, o_ref):
    # All three layers fused in VMEM. MXU matmuls take bf16 operands with f32
    # accumulation; bias add / relu / tanh stay in f32 (safe on v5e, whose
    # VPU/EUP lack bf16 — the kernel is HBM bound, so the cast passes are not
    # on the critical path; on v6e/v7x a bf16 elementwise path is an optional
    # further micro-opt).
    x = x_ref[...].astype(jnp.bfloat16)
    h1 = jnp.dot(x, w1_ref[...], preferred_element_type=jnp.float32) + b1_ref[...]
    h1 = jnp.maximum(h1, 0.0).astype(jnp.bfloat16)
    h2 = jnp.dot(h1, w2_ref[...], preferred_element_type=jnp.float32) + b2_ref[...]
    h2 = jnp.maximum(h2, 0.0).astype(jnp.bfloat16)
    m = jnp.dot(h2, w3_ref[...], preferred_element_type=jnp.float32) + b3_ref[...]
    # Padded lanes: tanh(0) = 0, sliced away in the wrapper. bf16 store halves
    # the dominant HBM write-back stream.
    o_ref[...] = jnp.tanh(m).astype(o_ref.dtype)


def prepare_params(params):
    """One-time parameter prep, hoisted out of the per-step forward.

    Casts weights to bf16 (MXU-native, halves the weight DMA) and lane-pads the
    output layer to a multiple of 128 so stores are full unmasked vst.
    """
    w1, b1, w2, b2, w3, b3 = params
    action_dim = w3.shape[1]
    padded_adim = _LANE * pl.cdiv(action_dim, _LANE)
    pad = padded_adim - action_dim
    w3p = jnp.pad(w3, ((0, 0), (0, pad))) if pad else w3
    b3p = jnp.pad(b3, ((0, 0), (0, pad))) if pad else b3
    return dict(
        w1=w1.astype(jnp.bfloat16), b1=b1.astype(jnp.float32),
        w2=w2.astype(jnp.bfloat16), b2=b2.astype(jnp.float32),
        w3=w3p.astype(jnp.bfloat16), b3=b3p.astype(jnp.float32),
        action_dim=action_dim,
    )


def policy_forward(x, prepared, *, block_batch=2048):
    """PolicyNetwork forward pass (returns the action mean), batch-tiled."""
    w1, b1 = prepared["w1"], prepared["b1"]
    w2, b2 = prepared["w2"], prepared["b2"]
    w3, b3 = prepared["w3"], prepared["b3"]
    action_dim = prepared["action_dim"]

    batch, state_dim = x.shape
    hidden = w1.shape[1]
    padded_adim = w3.shape[1]

    # --- batch tile selection -----------------------------------------------
    pb = _ROW_ALIGN * pl.cdiv(batch, _ROW_ALIGN)
    tb = min(block_batch, pb)
    # v7x: with ("parallel",) semantics a single-tile grid leaves one TC idle;
    # split into >=2 tiles once the batch is big enough to pay for it.
    if pb >= 2 * _MIN_SPLIT_ROWS:
        tb = min(tb, _ROW_ALIGN * pl.cdiv(pl.cdiv(pb, 2), _ROW_ALIGN))
    # Cap tb so 2x the tile footprint stays under the v7x scoped-VMEM budget.
    weight_bytes = (w1.size + w2.size + w3.size) * 2 + (b1.size + b2.size + b3.size) * 4
    per_row_bytes = 3 * (state_dim * 4 + padded_adim * 2) + 2 * hidden * 4
    max_tb = (_VMEM_CAP // 2 - weight_bytes) // per_row_bytes
    tb = max(_ROW_ALIGN, min(tb, _ROW_ALIGN * (max_tb // _ROW_ALIGN)))

    padded_batch = tb * pl.cdiv(pb, tb)
    xp = jnp.pad(x, ((0, padded_batch - batch), (0, 0))) if padded_batch != batch else x
    grid = (padded_batch // tb,)

    # Streamed x / out: triple-buffer only when there are enough grid steps to
    # hide the small per-tile DMAs. Weights/biases use constant index_maps so
    # they are DMA'd once and stay VMEM-resident across all batch tiles.
    stream_mode = pl.Buffered(3) if grid[0] > 2 else None
    n_buf = 3 if stream_mode is not None else 2

    def resident(shape):
        return pl.BlockSpec(shape, lambda i: tuple(0 for _ in shape))

    flops = 2 * padded_batch * (state_dim * hidden + hidden * hidden + hidden * padded_adim)
    bytes_accessed = (
        xp.size * 4 + padded_batch * padded_adim * 2
        + (w1.size + w2.size + w3.size) * 2
        + (b1.size + b2.size + b3.size) * 4
    )
    tile_bytes = (
        n_buf * (tb * state_dim * 4 + tb * padded_adim * 2)   # x / out buffers
        + weight_bytes                                        # resident params
        + 2 * tb * hidden * 4                                 # h1/h2 temporaries
    )
    vmem_limit = int(min(_VMEM_CAP, max(4 << 20, 2 * tile_bytes)))

    out = pl.pallas_call(
        _policy_mlp_kernel,
        out_shape=jax.ShapeDtypeStruct((padded_batch, padded_adim), jnp.bfloat16),
        grid=grid,
        in_specs=[
            pl.BlockSpec((tb, state_dim), lambda i: (i, 0), pipeline_mode=stream_mode),
            resident(w1.shape), resident(b1.shape),
            resident(w2.shape), resident(b2.shape),
            resident(w3.shape), resident(b3.shape),
        ],
        out_specs=pl.BlockSpec((tb, padded_adim), lambda i: (i, 0),
                               pipeline_mode=stream_mode),
        compiler_params=pltpu.CompilerParams(
            dimension_semantics=("parallel",),   # v7x: shard batch tiles over 2 TCs
            vmem_limit_bytes=vmem_limit,
        ),
        cost_estimate=pl.CostEstimate(
            flops=flops,
            bytes_accessed=bytes_accessed,
            transcendentals=padded_batch * padded_adim,
        ),
    )(xp, w1, b1, w2, b2, w3, b3)

    return out[:batch, :action_dim].astype(jnp.float32)


def init_params(key, state_dim, action_dim, hidden=128):
    """Deterministic init mimicking torch.nn.Linear (uniform +/- 1/sqrt(fan_in))."""
    ks = jax.random.split(key, 6)

    def linear(kw, kb, fan_in, fan_out):
        bound = 1.0 / jnp.sqrt(fan_in)
        w = jax.random.uniform(kw, (fan_in, fan_out), jnp.float32, -bound, bound)
        b = jax.random.uniform(kb, (1, fan_out), jnp.float32, -bound, bound)
        return w, b

    w1, b1 = linear(ks[0], ks[1], state_dim, hidden)
    w2, b2 = linear(ks[2], ks[3], hidden, hidden)
    w3, b3 = linear(ks[4], ks[5], hidden, action_dim)
    # TODO(synk): self.log_std / Normal sampling / REINFORCE update() are not
    # part of forward() and are intentionally not implemented as kernels.
    return (w1, b1, w2, b2, w3, b3)


def _reference(x, params):
    w1, b1, w2, b2, w3, b3 = params
    h1 = jnp.maximum(x @ w1 + b1, 0.0)
    h2 = jnp.maximum(h1 @ w2 + b2, 0.0)
    return jnp.tanh(h2 @ w3 + b3)


if __name__ == "__main__":
    key = jax.random.PRNGKey(0)
    k_param, k_x = jax.random.split(key)

    state_dim, action_dim = 16, 4
    raw_params = init_params(k_param, state_dim, action_dim)
    prepared = prepare_params(raw_params)   # one-time weight prep (hoisted)

    # bf16 MXU operands + bf16 output store -> relax tolerance vs. f32 reference.
    tol = dict(atol=5e-2, rtol=5e-2)

    # Small batch (single tile).
    x = jax.random.normal(k_x, (8, state_dim), jnp.float32)
    mean = policy_forward(x, prepared)
    jax.block_until_ready(mean)
    assert mean.shape == (8, action_dim)
    assert jnp.allclose(mean, _reference(x, raw_params), **tol)

    # Ragged batch (exercises row padding + slice-back).
    x2 = jax.random.normal(jax.random.fold_in(k_x, 1), (20, state_dim), jnp.float32)
    mean2 = policy_forward(x2, prepared)
    jax.block_until_ready(mean2)
    assert mean2.shape == (20, action_dim)
    assert jnp.allclose(mean2, _reference(x2, raw_params), **tol)

    # Multi-tile streaming path (grid > 2 -> Buffered(3) on x/out).
    x3 = jax.random.normal(jax.random.fold_in(k_x, 2), (384, state_dim), jnp.float32)
    mean3 = policy_forward(x3, prepared, block_batch=128)
    jax.block_until_ready(mean3)
    assert mean3.shape == (384, action_dim)
    assert jnp.allclose(mean3, _reference(x3, raw_params), **tol)

    print("KERNEL_OK")
</pallas_src>

<mosaic_0001>
module attributes {stable_mosaic.version = 11 : i64} {
  func.func @_policy_mlp_kernel(%arg0: i32, %arg1: memref<16x16xf32, #tpu.memory_space<vmem>>, %arg2: memref<16x128xbf16, #tpu.memory_space<vmem>>, %arg3: memref<1x128xf32, #tpu.memory_space<vmem>>, %arg4: memref<128x128xbf16, #tpu.memory_space<vmem>>, %arg5: memref<1x128xf32, #tpu.memory_space<vmem>>, %arg6: memref<128x128xbf16, #tpu.memory_space<vmem>>, %arg7: memref<1x128xf32, #tpu.memory_space<vmem>>, %arg8: memref<16x128xbf16, #tpu.memory_space<vmem>>) attributes {dimension_semantics = [#tpu.dimension_semantics<parallel>], iteration_bounds = array<i64: 1>, scalar_prefetch = 0 : i64, scratch_operands = 0 : i64, tpu.core_type = #tpu.core_type<tc>, window_params = [{transform_indices = @transform_0, window_bounds = array<i64: 16, 16>}, {pipeline_mode = #tpu.pipeline_mode<synchronous>, transform_indices = @transform_1, window_bounds = array<i64: 16, 128>}, {pipeline_mode = #tpu.pipeline_mode<synchronous>, transform_indices = @transform_2, window_bounds = array<i64: 1, 128>}, {pipeline_mode = #tpu.pipeline_mode<synchronous>, transform_indices = @transform_3, window_bounds = array<i64: 128, 128>}, {pipeline_mode = #tpu.pipeline_mode<synchronous>, transform_indices = @transform_4, window_bounds = array<i64: 1, 128>}, {pipeline_mode = #tpu.pipeline_mode<synchronous>, transform_indices = @transform_5, window_bounds = array<i64: 128, 128>}, {pipeline_mode = #tpu.pipeline_mode<synchronous>, transform_indices = @transform_6, window_bounds = array<i64: 1, 128>}, {transform_indices = @transform_7, window_bounds = array<i64: 16, 128>}]} {
    %c0 = arith.constant 0 : index
    %c0_0 = arith.constant 0 : index
    %0 = vector.load %arg1[%c0, %c0_0] : memref<16x16xf32, #tpu.memory_space<vmem>>, vector<16x16xf32>
    %1 = arith.truncf %0 : vector<16x16xf32> to vector<16x16xbf16>
    %c0_1 = arith.constant 0 : index
    %c0_2 = arith.constant 0 : index
    %2 = vector.load %arg2[%c0_1, %c0_2] : memref<16x128xbf16, #tpu.memory_space<vmem>>, vector<16x128xbf16>
    %cst = arith.constant dense<0.000000e+00> : vector<16x128xf32>
    %3 = tpu.matmul %1, %2, %cst {dimension_numbers = #tpu.dot_dimension_numbers<[1], [0], [0], [1], [0, 0, 1, 1], [], []>} : vector<16x16xbf16>, vector<16x128xbf16>, vector<16x128xf32> -> vector<16x128xf32>
    %c0_3 = arith.constant 0 : index
    %c0_4 = arith.constant 0 : index
    %4 = vector.load %arg3[%c0_3, %c0_4] : memref<1x128xf32, #tpu.memory_space<vmem>>, vector<1x128xf32>
    %5 = vector.broadcast %4 : vector<1x128xf32> to vector<16x128xf32>
    %6 = arith.addf %3, %5 : vector<16x128xf32>
    %cst_5 = arith.constant 0.000000e+00 : f32
    %7 = vector.broadcast %cst_5 : f32 to vector<16x128xf32>
    %8 = arith.maximumf %6, %7 : vector<16x128xf32>
    %9 = arith.truncf %8 : vector<16x128xf32> to vector<16x128xbf16>
    %c0_6 = arith.constant 0 : index
    %c0_7 = arith.constant 0 : index
    %10 = vector.load %arg4[%c0_6, %c0_7] : memref<128x128xbf16, #tpu.memory_space<vmem>>, vector<128x128xbf16>
    %cst_8 = arith.constant dense<0.000000e+00> : vector<16x128xf32>
    %11 = tpu.matmul %9, %10, %cst_8 {dimension_numbers = #tpu.dot_dimension_numbers<[1], [0], [0], [1], [0, 0, 1, 1], [], []>} : vector<16x128xbf16>, vector<128x128xbf16>, vector<16x128xf32> -> vector<16x128xf32>
    %c0_9 = arith.constant 0 : index
    %c0_10 = arith.constant 0 : index
    %12 = vector.load %arg5[%c0_9, %c0_10] : memref<1x128xf32, #tpu.memory_space<vmem>>, vector<1x128xf32>
    %13 = vector.broadcast %12 : vector<1x128xf32> to vector<16x128xf32>
    %14 = arith.addf %11, %13 : vector<16x128xf32>
    %cst_11 = arith.constant 0.000000e+00 : f32
    %15 = vector.broadcast %cst_11 : f32 to vector<16x128xf32>
    %16 = arith.maximumf %14, %15 : vector<16x128xf32>
    %17 = arith.truncf %16 : vector<16x128xf32> to vector<16x128xbf16>
    %c0_12 = arith.constant 0 : index
    %c0_13 = arith.constant 0 : index
    %18 = vector.load %arg6[%c0_12, %c0_13] : memref<128x128xbf16, #tpu.memory_space<vmem>>, vector<128x128xbf16>
    %cst_14 = arith.constant dense<0.000000e+00> : vector<16x128xf32>
    %19 = tpu.matmul %17, %18, %cst_14 {dimension_numbers = #tpu.dot_dimension_numbers<[1], [0], [0], [1], [0, 0, 1, 1], [], []>} : vector<16x128xbf16>, vector<128x128xbf16>, vector<16x128xf32> -> vector<16x128xf32>
    %c0_15 = arith.constant 0 : index
    %c0_16 = arith.constant 0 : index
    %20 = vector.load %arg7[%c0_15, %c0_16] : memref<1x128xf32, #tpu.memory_space<vmem>>, vector<1x128xf32>
    %21 = vector.broadcast %20 : vector<1x128xf32> to vector<16x128xf32>
    %22 = arith.addf %19, %21 : vector<16x128xf32>
    %23 = math.tanh %22 : vector<16x128xf32>
    %24 = arith.truncf %23 : vector<16x128xf32> to vector<16x128xbf16>
    %c0_17 = arith.constant 0 : index
    %c0_18 = arith.constant 0 : index
    %25 = vector.load %arg8[%c0_17, %c0_18] : memref<16x128xbf16, #tpu.memory_space<vmem>>, vector<16x128xbf16>
    tpu.vector_store %arg8[%c0_17, %c0_18], %24 {strides = array<i32>} : memref<16x128xbf16, #tpu.memory_space<vmem>>, vector<16x128xbf16>,
    return
  }
  func.func @transform_0(%arg0: i32) -> (i32, i32) {
    %c0_i32 = arith.constant 0 : i32
    %c0_i32_0 = arith.constant 0 : i32
    return %arg0, %c0_i32 : i32, i32
  }
  func.func @transform_1(%arg0: i32) -> (i32, i32) {
    %c0_i32 = arith.constant 0 : i32
    %c0_i32_0 = arith.constant 0 : i32
    %c0_i32_1 = arith.constant 0 : i32
    return %c0_i32, %c0_i32_0 : i32, i32
  }
  func.func @transform_2(%arg0: i32) -> (i32, i32) {
    %c0_i32 = arith.constant 0 : i32
    %c0_i32_0 = arith.constant 0 : i32
    %c0_i32_1 = arith.constant 0 : i32
    return %c0_i32, %c0_i32_0 : i32, i32
  }
  func.func @transform_3(%arg0: i32) -> (i32, i32) {
    %c0_i32 = arith.constant 0 : i32
    %c0_i32_0 = arith.constant 0 : i32
    %c0_i32_1 = arith.constant 0 : i32
    return %c0_i32, %c0_i32_0 : i32, i32
  }
  func.func @transform_4(%arg0: i32) -> (i32, i32) {
    %c0_i32 = arith.constant 0 : i32
    %c0_i32_0 = arith.constant 0 : i32
    %c0_i32_1 = arith.constant 0 : i32
    return %c0_i32, %c0_i32_0 : i32, i32
  }
  func.func @transform_5(%arg0: i32) -> (i32, i32) {
    %c0_i32 = arith.constant 0 : i32
    %c0_i32_0 = arith.constant 0 : i32
    %c0_i32_1 = arith.constant 0 : i32
    return %c0_i32, %c0_i32_0 : i32, i32
  }
  func.func @transform_6(%arg0: i32) -> (i32, i32) {
    %c0_i32 = arith.constant 0 : i32
    %c0_i32_0 = arith.constant 0 : i32
    %c0_i32_1 = arith.constant 0 : i32
    return %c0_i32, %c0_i32_0 : i32, i32
  }
  func.func @transform_7(%arg0: i32) -> (i32, i32) {
    %c0_i32 = arith.constant 0 : i32
    %c0_i32_0 = arith.constant 0 : i32
    return %arg0, %c0_i32 : i32, i32
  }
}

</mosaic_0001>

<bundles_post_ra>
// kernel: tpu_custom_call.1
= control target key start
LH: loop header
LB: loop body
LE: loop exit
PB: predicated region body
PF: predicated region fallthrough
CT: control target
= control target key end

     0   :  { %12 = vsyncpa [#allocation3], 0  ;;  %s815_s0 = inlined_call_operand.hbm [shape: f32[16,16], index: 0, kind: input, shape index: {}]   ;;  %s816_s1 = inlined_call_operand.hbm [shape: bf16[16,128], index: 1, kind: input, shape index: {}]   ;;  %s817_s2 = inlined_call_operand.vmem [shape: f32[1,128], index: 2, kind: input, shape index: {}]   ;;  %s818_s3 = inlined_call_operand.hbm [shape: bf16[128,128], index: 3, kind: input, shape index: {}]   ;;  %s819_s4 = inlined_call_operand.vmem [shape: f32[1,128], index: 4, kind: input, shape index: {}]   ;;  %s820_s5 = inlined_call_operand.hbm [shape: bf16[128,128], index: 5, kind: input, shape index: {}]   ;;  %s821_s6 = inlined_call_operand.vmem [shape: f32[1,128], index: 6, kind: input, shape index: {}]   ;;  %s822_s7 = inlined_call_operand.hbm [shape: bf16[16,128], index: 7, kind: output, shape index: {}]  }
   0x1   :  { %13 = vsyncpa [#allocation6], 0 }
   0x2   :  { %14 = vsyncpa [#allocation9], 0 }
   0x3   :  { %15 = vsyncpa [#allocation4], 0  ;;  %s653_s24 = smov [#allocation5]   ;;  %s535_s28 = scalar_lea.hbm %s816_s1, 128 }
   0x4   :  { %s33_s25 = sshll.u32 %s653_s24, 4  ;;  %p536_p0 = scmp.ne.s32.totalorder %s816_s1, %s535_s28  ;;  %s34_s25 = int_to_ptr.vmem [resolvable:$true] %s33_s25 }
   0x5   :  { %p539_p1 = scmp.lt.u32.totalorder %s535_s28, %s816_s1 }
   0x7   :  { %p541_p2 = pnand %p539_p1, %p536_p0 }
   0x9   :  { %544 = shalt.err (!%p541_p2)
}
   0xa   :  { %s545_s10 = scalar_lea.vmem %s34_s25, 128  ;;  %p550_p4 = scmp.lt.s32.totalorder %s34_s25, %s34_s25 }
   0xb   :  { %p546_p3 = scmp.ne.s32.totalorder %s34_s25, %s545_s10  ;;  %p551_p5 = scmp.lt.s32.totalorder %s545_s10, %s545_s10 }
   0xd   :  { %p552_p6 = por %p551_p5, %p550_p4 }
   0xf   :  { %p553_p7 = pnand %p552_p6, %p546_p3 }
  0x11   :  { %556 = shalt.err (!%p553_p7)
}
  0x12   :  { %s654_s11 = smov 64   ;;  %s655_s12 = smov 4  }
  0x13   :  { %39 = dma.hbm_to_vmem [thread:$0]  %s816_s1, 128, %s34_s25, [#allocation6], %s654_s11, %s654_s11, %s655_s12  }
  0x14   :  { %s656_s15 = smov [#allocation2]   ;;  %s557_s19 = scalar_lea.hbm %s815_s0, 256 }
  0x15   :  { %s21_s16 = sshll.u32 %s656_s15, 4  ;;  %p558_p8 = scmp.ne.s32.totalorder %s815_s0, %s557_s19  ;;  %s22_s16 = int_to_ptr.vmem [resolvable:$true] %s21_s16 }
  0x16   :  { %p561_p9 = scmp.lt.u32.totalorder %s557_s19, %s815_s0 }
  0x18   :  { %p563_p10 = pnand %p561_p9, %p558_p8 }
  0x1a   :  { %566 = shalt.err (!%p563_p10)
}
  0x1b   :  { %s567_s24 = scalar_lea.vmem %s22_s16, 256  ;;  %p572_p12 = scmp.lt.s32.totalorder %s22_s16, %s22_s16 }
  0x1c   :  { %p568_p11 = scmp.ne.s32.totalorder %s22_s16, %s567_s24  ;;  %p573_p13 = scmp.lt.s32.totalorder %s567_s24, %s567_s24 }
  0x1e   :  { %p574_p0 = por %p573_p13, %p572_p12 }
  0x20   :  { %p575_p1 = pnand %p574_p0, %p568_p11 }
  0x22   :  { %578 = shalt.err (!%p575_p1)
}
  0x23   :  { %s657_s1 = smov 128   ;;  %s658_s25 = smov 8  }
  0x24   :  { %27 = dma.hbm_to_vmem [thread:$0]  %s815_s0, 256, %s22_s16, [#allocation3], %s657_s1, %s657_s1, %s658_s25  }
  0x25   :  { %s659_s28 = smov [#allocation7]   ;;  %s660_s30 = smov [#allocation8]  }
  0x26   :  { %s47_s29 = sshll.u32 %s659_s28, 4  ;;  %s61_s8 = sshll.u32 %s660_s30, 4  ;;  %s48_s29 = int_to_ptr.vmem [resolvable:$true] %s47_s29  ;;  %s731_s8 = int_to_ptr.vmem [resolvable:$true] %s61_s8 }
  0x27   :  { %s579_s13 = scalar_lea.hbm %s818_s3, 1024 }
  0x28   :  { %p580_p2 = scmp.ne.s32.totalorder %s818_s3, %s579_s13  ;;  %p583_p3 = scmp.lt.u32.totalorder %s579_s13, %s818_s3 }
  0x2a   :  { %p585_p4 = pnand %p583_p3, %p580_p2 }
  0x2c   :  { %588 = shalt.err (!%p585_p4)
}
  0x2d   :  { %s589_s0 = scalar_lea.vmem %s48_s29, 1024  ;;  %p594_p6 = scmp.lt.s32.totalorder %s48_s29, %s48_s29 }
  0x2e   :  { %p590_p5 = scmp.ne.s32.totalorder %s48_s29, %s589_s0  ;;  %p595_p7 = scmp.lt.s32.totalorder %s589_s0, %s589_s0 }
  0x30   :  { %p596_p8 = por %p595_p7, %p594_p6 }
  0x32   :  { %p597_p9 = pnand %p596_p8, %p590_p5 }
  0x34   :  { %600 = shalt.err (!%p597_p9)
}
  0x35   :  { %53 = dma.hbm_to_vmem [thread:$0]  %s818_s3, 1024, %s48_s29, [#allocation6], %s654_s11, %s654_s11, %s655_s12  }
  0x36   :  { %s601_s22 = scalar_lea.hbm %s820_s5, 1024 }
  0x37   :  { %p602_p10 = scmp.ne.s32.totalorder %s820_s5, %s601_s22  ;;  %p605_p11 = scmp.lt.u32.totalorder %s601_s22, %s820_s5 }
  0x39   :  { %p607_p12 = pnand %p605_p11, %p602_p10 }
  0x3b   :  { %610 = shalt.err (!%p607_p12)
}
  0x3c   :  { %s611_s26 = scalar_lea.vmem %s731_s8, 1024  ;;  %p616_p0 = scmp.lt.s32.totalorder %s731_s8, %s731_s8 }
  0x3d   :  { %p612_p13 = scmp.ne.s32.totalorder %s731_s8, %s611_s26  ;;  %p617_p1 = scmp.lt.s32.totalorder %s611_s26, %s611_s26 }
  0x3f   :  { %p618_p2 = por %p617_p1, %p616_p0 }
  0x41   :  { %p619_p3 = pnand %p618_p2, %p612_p13 }
  0x43   :  { %622 = shalt.err (!%p619_p3)
}
  0x44   :  { %67 = dma.hbm_to_vmem [thread:$0]  %s820_s5, 1024, %s731_s8, [#allocation9], %s654_s11, %s654_s11, %s655_s12  }
  0x45   :  { %645 = dma.done.wait [#allocation3], 256  }
  0x46   :  { %646 = vsyncadd [#allocation3], 4294967040 }
  0x47   :  { %647 = dma.done.wait [#allocation6], 1152  }
  0x48   :  { %648 = vsyncadd [#allocation6], 4294966144 }
  0x49   :  { %649 = dma.done.wait [#allocation9], 1024  }
  0x4a   :  { %650 = vsyncadd [#allocation9], 4294966272  ;;  %v661_v0 = vmov 0.0   ;;  %vm662_vm0 = vmmov 0   ;;  %v514_v1 = vld [vmem:[#allocation5] sm:$0xff]   ;;  %v83_v2 = vld [vmem:[#allocation2] sm:$0xff] }
  0x4b   :  { %457 = vmatprep.subr.bf16.mxu0 %v661_v0  ;;  %459 = vmatprep.mubr.msk.bf16.mxu0 %vm662_vm0, %v661_v0  ;;  %v84_v3 = vld [vmem:[#allocation2 + $0x8] sm:$0xff]  ;;  %vm101_vm1 = vcmask 130048   ;;  %v515_v5 = vld [vmem:[#allocation7] sm:$0xff]   ;;  %v516_v6 = vld [vmem:[#allocation7 + $0x8] sm:$0xff]  }
  0x4c   :  { %463 = vmatprep.subr.bf16.mxu1 %v661_v0  ;;  %479 = vmatprep.mubr.msk.bf16.mxu1 %vm662_vm0, %v661_v0  ;;  %v85_v4 = vpack.c.bf16 %v84_v3, %v83_v2  ;;  %v517_v7 = vld [vmem:[#allocation7 + $0x10] sm:$0xff]   ;;  %v518_v8 = vld [vmem:[#allocation7 + $0x18] sm:$0xff]   ;;  %v519_v9 = vld [vmem:[#allocation7 + $0x20] sm:$0xff]  }
  0x4d   :  { %458 = vmatpush3.bf16.msra.mxu0 %v514_v1  ;;  %464 = vmatpush3.bf16.msra.mxu1 %v515_v5  ;;  %v520_v10 = vld [vmem:[#allocation7 + $0x28] sm:$0xff]   ;;  %v521_v11 = vld [vmem:[#allocation7 + $0x30] sm:$0xff]   ;;  %v522_v12 = vld [vmem:[#allocation7 + $0x38] sm:$0xff]  }
  0x4e   :  { %483 = vmatprep.subr.bf16.mxu0 %v661_v0  ;;  %465 = vmatprep.subr.bf16.mxu1 %v661_v0  ;;  %v523_v13 = vld [vmem:[#allocation8] sm:$0xff]   ;;  %v524_v14 = vld [vmem:[#allocation8 + $0x8] sm:$0xff]   ;;  %v525_v15 = vld [vmem:[#allocation8 + $0x10] sm:$0xff]  }
  0x4f   :  { %v526_v16 = vld [vmem:[#allocation8 + $0x18] sm:$0xff]   ;;  %v527_v17 = vld [vmem:[#allocation8 + $0x20] sm:$0xff]   ;;  %v528_v18 = vld [vmem:[#allocation8 + $0x28] sm:$0xff]  }
  0x50   :  { %460 = vmatmul.mubr.msk.bf16.vlgmr.msra.gmra.mrb[0].mxu0 %vm101_vm1, %v85_v4  ;;  %v407_v19 = vld [vmem:[%s817_s2] ss:$0 sm:$0xff]  ;;  %v529_v29 = vld [vmem:[#allocation8 + $0x30] sm:$0xff]   ;;  %v530_v30 = vld [vmem:[#allocation8 + $0x38] sm:$0xff]  }
  0x51   :  { %499 = vmatprep.mubr.msk.bf16.mxu0 %vm662_vm0, %v661_v0  ;;  %466 = vmatpush3.bf16.msra.mxu1 %v516_v6  ;;  %v410_v31 = vld [vmem:[%s819_s4] ss:$0 sm:$0xff]  ;;  %s663_s4 = smov [#allocation10]  }
  0x52   :  { %467 = vmatprep.subr.bf16.mxu1 %v661_v0  ;;  %484 = vmatpush3.bf16.msra.mxu0 %v523_v13  ;;  %v419_v41 = vld [vmem:[%s821_s6] ss:$0 sm:$0xff]  ;;  %s393_s9 = sshll.u32 %s663_s4, 4  ;;  %s394_s9 = int_to_ptr.vmem [resolvable:$true] %s393_s9 }
  0x53   :  { %485 = vmatprep.subr.bf16.mxu0 %v661_v0  ;;  %s623_s10 = scalar_lea.vmem %s394_s9, 128  ;;  %p628_p5 = scmp.lt.s32.totalorder %s394_s9, %s394_s9 }
  0x54   :  { %p624_p4 = scmp.ne.s32.totalorder %s394_s9, %s623_s10  ;;  %p629_p6 = scmp.lt.s32.totalorder %s623_s10, %s623_s10 }
  0x55   :  { %468 = vmatpush3.bf16.msra.mxu1 %v517_v7 }
  0x56   :  { %469 = vmatprep.subr.bf16.mxu1 %v661_v0  ;;  %486 = vmatpush3.bf16.msra.mxu0 %v524_v14  ;;  %p630_p7 = por %p629_p6, %p628_p5 }
  0x57   :  { %487 = vmatprep.subr.bf16.mxu0 %v661_v0 }
  0x58   :  { %p631_p8 = pnand %p630_p7, %p624_p4 }
  0x59   :  { %470 = vmatpush3.bf16.msra.mxu1 %v518_v8 }
  0x5a   :  { %471 = vmatprep.subr.bf16.mxu1 %v661_v0  ;;  %488 = vmatpush3.bf16.msra.mxu0 %v525_v15 }
  0x5b   :  { %489 = vmatprep.subr.bf16.mxu0 %v661_v0 }
  0x5d   :  { %472 = vmatpush3.bf16.msra.mxu1 %v519_v9 }
  0x5e   :  { %473 = vmatprep.subr.bf16.mxu1 %v661_v0  ;;  %490 = vmatpush3.bf16.msra.mxu0 %v526_v16 }
  0x5f   :  { %491 = vmatprep.subr.bf16.mxu0 %v661_v0 }
  0x61   :  { %474 = vmatpush3.bf16.msra.mxu1 %v520_v10 }
  0x62   :  { %475 = vmatprep.subr.bf16.mxu1 %v661_v0  ;;  %492 = vmatpush3.bf16.msra.mxu0 %v527_v17 }
  0x63   :  { %493 = vmatprep.subr.bf16.mxu0 %v661_v0 }
  0x65   :  { %476 = vmatpush3.bf16.msra.mxu1 %v521_v11 }
  0x66   :  { %477 = vmatprep.subr.bf16.mxu1 %v661_v0  ;;  %494 = vmatpush3.bf16.msra.mxu0 %v528_v18 }
  0x67   :  { %495 = vmatprep.subr.bf16.mxu0 %v661_v0 }
  0x69   :  { %478 = vmatpush3.bf16.msra.mxu1 %v522_v12 }
  0x6a   :  { %496 = vmatpush3.bf16.msra.mxu0 %v529_v29 }
  0x6b   :  { %497 = vmatprep.subr.bf16.mxu0 %v661_v0 }
  0x6e   :  { %498 = vmatpush3.bf16.msra.mxu0 %v530_v30 }
 0x123   :  { %v139_v20 = vpop.f32.mrb[0].mxu0 }
 0x124   :  { %v140_v21 = vadd.f32 %v407_v19, %v139_v20  ;;  %v461_v22 = vpop.f32.mrb[1].mxu0 }
 0x125   :  { %v142_v23 = vpop.f32.mrb[2].mxu0 }
 0x126   :  { %v143_v24 = vadd.f32 %v407_v19, %v142_v23  ;;  %v462_v25 = vpop.f32.mrb[3].mxu0  ;;  %v146_v26 = vmax.f32 %v140_v21, 0.0 }
 0x128   :  { %v147_v27 = vmax.f32 %v143_v24, 0.0 }
 0x12a   :  { %v148_v28 = vpack.c.bf16 %v147_v27, %v146_v26 }
 0x12c   :  { %480 = vmatmul.mubr.bf16.vlgmr.msra.gmra.mrb[0].mxu1 %v148_v28 }
 0x1ff   :  { %v254_v32 = vpop.f32.mrb[0].mxu1 }
 0x200   :  { %v255_v33 = vadd.f32 %v410_v31, %v254_v32  ;;  %v481_v34 = vpop.f32.mrb[1].mxu1 }
 0x201   :  { %v257_v35 = vpop.f32.mrb[2].mxu1 }
 0x202   :  { %v258_v36 = vadd.f32 %v410_v31, %v257_v35  ;;  %v482_v37 = vpop.f32.mrb[3].mxu1  ;;  %v261_v38 = vmax.f32 %v255_v33, 0.0 }
 0x204   :  { %v262_v39 = vmax.f32 %v258_v36, 0.0 }
 0x206   :  { %v263_v40 = vpack.c.bf16 %v262_v39, %v261_v38 }
 0x208   :  { %500 = vmatmul.mubr.bf16.vlgmr.msra.gmra.mrb[4].mxu0 %v263_v40 }
 0x2db   :  { %v369_v42 = vpop.f32.mrb[4].mxu0 }
 0x2dc   :  { %v370_v43 = vadd.f32 %v419_v41, %v369_v42  ;;  %v501_v44 = vpop.f32.mrb[5].mxu0 }
 0x2dd   :  { %v372_v45 = vpop.f32.mrb[6].mxu0 }
 0x2de   :  { %v373_v46 = vadd.f32 %v419_v41, %v372_v45  ;;  %v502_v47 = vpop.f32.mrb[7].mxu0  ;;  %531 = vtanh.f32 %v370_v43 }
 0x2e0   :  { %533 = vtanh.f32 %v373_v46 }
 0x2e8   :  { %v532_v48 = vpop.eup %531 }
 0x2ea   :  { %v534_v49 = vpop.eup %533 }
 0x2eb   :  { %v435_v50 = vpack.c.bf16 %v534_v49, %v532_v48 }
 0x2ed   :  { %436 = vst [vmem:[#allocation10] sm:$0xff] %v435_v50  }
 0x2ee   :  { %634 = shalt.err (!%p631_p8)
}
 0x2ef   :  { %s635_s14 = scalar_lea.hbm %s822_s7, 128 }
 0x2f0   :  { %p636_p9 = scmp.ne.s32.totalorder %s822_s7, %s635_s14  ;;  %p639_p10 = scmp.lt.u32.totalorder %s635_s14, %s822_s7 }
 0x2f2   :  { %p641_p11 = pnand %p639_p10, %p636_p9 }
 0x2f4   :  { %644 = shalt.err (!%p641_p11)
}
 0x2f5   :  { %399 = dma.vmem_to_hbm [thread:$0]  %s394_s9, 128, %s822_s7, [#allocation4], %s654_s11, %s654_s11, %s655_s12  }
 0x2f6   :  { %651 = dma.done.wait [#allocation4], 128  }
 0x2f7   :  { %652 = vsyncadd [#allocation4], 4294967168 }
 0x2f8   :  { %403 = vsyncpa [#allocation3], 1 }
 0x2f9   :  { %404 = vsyncpa [#allocation6], 1 }
 0x2fa   :  { %405 = vsyncpa [#allocation9], 1 }
 0x2fb   :  { %406 = vsyncpa [#allocation4], 1 }

</bundles_post_ra>
